<compile_context>
chip_gen: v7x
topology: tpu7x:2x2x1
jax: 0.10.0
libtpu: 0.0.40
codegen_flags: <defaults>
</compile_context>

<pallas_src>
import functools

import jax
import jax.numpy as jnp
from jax.experimental import pallas as pl
from jax.experimental.pallas import tpu as pltpu


def _mlp_kernel(x_ref, w1_ref, b1_ref, w2_ref, b2_ref, w3_ref, b3_ref, o_ref):
    # x arrives as f32 from HBM; cast to bf16 on the VPU (free slot) for the MXU.
    x = x_ref[...].astype(jnp.bfloat16)                                # (TB, 256)

    # linear_1 + relu  (f32 accumulation, f32 elementwise)
    v1 = jnp.dot(x, w1_ref[...], preferred_element_type=jnp.float32) + b1_ref[...]   # (TB,128)
    v2 = jnp.maximum(v1, 0.0)

    # linear_2 + relu  (weights pre-padded to 128 output lanes; padded lanes stay 0)
    v3 = jnp.dot(v2.astype(jnp.bfloat16), w2_ref[...],
                 preferred_element_type=jnp.float32) + b2_ref[...]                    # (TB,128)
    v4 = jnp.maximum(v3, 0.0)

    # linear_3 + relu  (weights pre-padded to 128x128; padded lanes stay 0)
    v5 = jnp.dot(v4.astype(jnp.bfloat16), w3_ref[...],
                 preferred_element_type=jnp.float32) + b3_ref[...]                    # (TB,128)
    v6 = jnp.maximum(v5, 0.0)

    # combine — everything is already 128 lanes wide; single full-tile store.
    v7 = v1 * v5
    o_ref[...] = (v2 + v4 + v6 + v7).astype(o_ref.dtype)


def prepare_params(w1, b1, w2, b2, w3, b3):
    """One-time prep: zero-pad linear_2/linear_3 to 128 output lanes, cast weights
    to bf16.  Call this once and reuse; keeps the XLA pad/cast ops off the
    per-call latency path."""
    w2p = jnp.zeros((128, 128), jnp.float32).at[:, : w2.shape[1]].set(w2)
    b2p = jnp.zeros((1, 128), jnp.float32).at[:, : b2.shape[1]].set(b2)
    w3p = jnp.zeros((128, 128), jnp.float32).at[: w3.shape[0], : w3.shape[1]].set(w3)
    b3p = jnp.zeros((1, 128), jnp.float32).at[:, : b3.shape[1]].set(b3)
    return (w1.astype(jnp.bfloat16), b1.astype(jnp.float32),
            w2p.astype(jnp.bfloat16), b2p,
            w3p.astype(jnp.bfloat16), b3p)


def _select_tile(batch, tb):
    """Pick the batch tile: as large as allowed, multiple of 8, and guaranteeing
    >= 2 grid steps when B > 8 so megacore ('parallel') can split the work."""
    if batch <= 8:
        return batch
    half = -(-batch // 2)               # cdiv(B, 2)
    half = ((half + 7) // 8) * 8        # round up to multiple of 8
    return max(8, min(tb, half))


@functools.partial(jax.jit, static_argnames=("tb",))
def mlp_forward(x, w1b, b1f, w2p, b2p, w3p, b3p, *, tb=2048):
    B, K = x.shape
    assert K == 256

    tb_eff = _select_tile(B, tb)
    grid = (pl.cdiv(B, tb_eff),)

    const = lambda i: (0, 0)   # weights/biases stay VMEM-resident across grid steps
    return pl.pallas_call(
        _mlp_kernel,
        out_shape=jax.ShapeDtypeStruct((B, 128), jnp.float32),
        grid_spec=pltpu.PrefetchScalarGridSpec(
            num_scalar_prefetch=0,
            grid=grid,
            in_specs=[
                pl.BlockSpec((tb_eff, 256), lambda i: (i, 0)),   # x stream (f32)
                pl.BlockSpec((256, 128), const),                 # W1 (bf16)
                pl.BlockSpec((1, 128), const),                   # b1
                pl.BlockSpec((128, 128), const),                 # W2 (padded, bf16)
                pl.BlockSpec((1, 128), const),                   # b2 (padded)
                pl.BlockSpec((128, 128), const),                 # W3 (padded, bf16)
                pl.BlockSpec((1, 128), const),                   # b3 (padded)
            ],
            out_specs=pl.BlockSpec((tb_eff, 128), lambda i: (i, 0)),
        ),
        compiler_params=pltpu.CompilerParams(
            dimension_semantics=("parallel",),
            vmem_limit_bytes=32 << 20,
        ),
    )(x, w1b, b1f, w2p, b2p, w3p, b3p)


def _ref_forward(x, w1, b1, w2, b2, w3, b3):
    """Plain-JAX reference mirroring the kernel's bf16-input / f32-accumulate path."""
    bf = lambda a: a.astype(jnp.bfloat16)
    v1 = jnp.dot(bf(x), bf(w1), preferred_element_type=jnp.float32) + b1
    v2 = jnp.maximum(v1, 0.0)
    v3 = jnp.dot(bf(v2), bf(w2), preferred_element_type=jnp.float32) + b2
    v4 = jnp.maximum(v3, 0.0)
    v5 = jnp.dot(bf(v4), bf(w3), preferred_element_type=jnp.float32) + b3
    v6 = jnp.maximum(v5, 0.0)
    pad = lambda a: jnp.pad(a, ((0, 0), (0, 128 - a.shape[-1])))
    v7 = v1 * pad(v5)
    return v2 + pad(v4) + pad(v6) + v7


if __name__ == "__main__":
    key = jax.random.PRNGKey(0)
    kx, kx2, k1, k2, k3, kb1, kb2, kb3 = jax.random.split(key, 8)

    # deterministic torch.nn.Linear-style init: uniform(-1/sqrt(fan_in), 1/sqrt(fan_in))
    def uinit(k, shape, fan_in):
        bound = 1.0 / jnp.sqrt(jnp.float32(fan_in))
        return jax.random.uniform(k, shape, jnp.float32, -bound, bound)

    w1 = uinit(k1, (256, 128), 256)   # (in, out) layout: y = x @ W + b
    b1 = uinit(kb1, (1, 128), 256)
    w2 = uinit(k2, (128, 64), 128)
    b2 = uinit(kb2, (1, 64), 128)
    w3 = uinit(k3, (64, 32), 64)
    b3 = uinit(kb3, (1, 32), 64)

    # One-time parameter prep (padding + bf16 cast), reused across calls.
    params = prepare_params(w1, b1, w2, b2, w3, b3)

    # 1) Shape matching the original module: x1 = torch.randn(1, 256)
    x = jax.random.normal(kx, (1, 256), jnp.float32)
    out = jax.block_until_ready(mlp_forward(x, *params))
    ref = _ref_forward(x, w1, b1, w2, b2, w3, b3)
    assert out.shape == (1, 128)
    assert jnp.allclose(out, ref, atol=1e-2, rtol=1e-2)

    # 2) Small batched case exercising the multi-step tiled grid
    #    (B=64 with tb=16 -> tile selection yields grid of >= 2 steps).
    xb = jax.random.normal(kx2, (64, 256), jnp.float32)
    outb = jax.block_until_ready(mlp_forward(xb, *params, tb=16))
    refb = _ref_forward(xb, w1, b1, w2, b2, w3, b3)
    assert outb.shape == (64, 128)
    assert jnp.allclose(outb, refb, atol=1e-2, rtol=1e-2)

    # 3) Default-tile path (tb=2048, B=64 -> single tile capped at cdiv(B,2)=32,
    #    so the grid still has 2 parallel steps for megacore).
    outc = jax.block_until_ready(mlp_forward(xb, *params))
    assert outc.shape == (64, 128)
    assert jnp.allclose(outc, refb, atol=1e-2, rtol=1e-2)

    print("KERNEL_OK")
</pallas_src>

<mosaic_0001>
module attributes {stable_mosaic.version = 11 : i64} {
  func.func @_mlp_kernel(%arg0: i32, %arg1: memref<1x256xf32, #tpu.memory_space<vmem>>, %arg2: memref<256x128xbf16, #tpu.memory_space<vmem>>, %arg3: memref<1x128xf32, #tpu.memory_space<vmem>>, %arg4: memref<128x128xbf16, #tpu.memory_space<vmem>>, %arg5: memref<1x128xf32, #tpu.memory_space<vmem>>, %arg6: memref<128x128xbf16, #tpu.memory_space<vmem>>, %arg7: memref<1x128xf32, #tpu.memory_space<vmem>>, %arg8: memref<1x128xf32, #tpu.memory_space<vmem>>) attributes {dimension_semantics = [#tpu.dimension_semantics<parallel>], iteration_bounds = array<i64: 1>, scalar_prefetch = 0 : i64, scratch_operands = 0 : i64, tpu.core_type = #tpu.core_type<tc>, window_params = [{transform_indices = @transform_0, window_bounds = array<i64: 1, 256>}, {pipeline_mode = #tpu.pipeline_mode<synchronous>, transform_indices = @transform_1, window_bounds = array<i64: 256, 128>}, {pipeline_mode = #tpu.pipeline_mode<synchronous>, transform_indices = @transform_2, window_bounds = array<i64: 1, 128>}, {pipeline_mode = #tpu.pipeline_mode<synchronous>, transform_indices = @transform_3, window_bounds = array<i64: 128, 128>}, {pipeline_mode = #tpu.pipeline_mode<synchronous>, transform_indices = @transform_4, window_bounds = array<i64: 1, 128>}, {pipeline_mode = #tpu.pipeline_mode<synchronous>, transform_indices = @transform_5, window_bounds = array<i64: 128, 128>}, {pipeline_mode = #tpu.pipeline_mode<synchronous>, transform_indices = @transform_6, window_bounds = array<i64: 1, 128>}, {transform_indices = @transform_7, window_bounds = array<i64: 1, 128>}]} {
    %c0 = arith.constant 0 : index
    %c0_0 = arith.constant 0 : index
    %0 = vector.load %arg1[%c0, %c0_0] : memref<1x256xf32, #tpu.memory_space<vmem>>, vector<1x256xf32>
    %1 = arith.truncf %0 : vector<1x256xf32> to vector<1x256xbf16>
    %c0_1 = arith.constant 0 : index
    %c0_2 = arith.constant 0 : index
    %2 = vector.load %arg2[%c0_1, %c0_2] : memref<256x128xbf16, #tpu.memory_space<vmem>>, vector<256x128xbf16>
    %cst = arith.constant dense<0.000000e+00> : vector<1x128xf32>
    %3 = tpu.matmul %1, %2, %cst {dimension_numbers = #tpu.dot_dimension_numbers<[1], [0], [0], [1], [0, 0, 1, 1], [], []>} : vector<1x256xbf16>, vector<256x128xbf16>, vector<1x128xf32> -> vector<1x128xf32>
    %c0_3 = arith.constant 0 : index
    %c0_4 = arith.constant 0 : index
    %4 = vector.load %arg3[%c0_3, %c0_4] : memref<1x128xf32, #tpu.memory_space<vmem>>, vector<1x128xf32>
    %5 = arith.addf %3, %4 : vector<1x128xf32>
    %cst_5 = arith.constant 0.000000e+00 : f32
    %6 = vector.broadcast %cst_5 : f32 to vector<1x128xf32>
    %7 = arith.maximumf %5, %6 : vector<1x128xf32>
    %8 = arith.truncf %7 : vector<1x128xf32> to vector<1x128xbf16>
    %c0_6 = arith.constant 0 : index
    %c0_7 = arith.constant 0 : index
    %9 = vector.load %arg4[%c0_6, %c0_7] : memref<128x128xbf16, #tpu.memory_space<vmem>>, vector<128x128xbf16>
    %cst_8 = arith.constant dense<0.000000e+00> : vector<1x128xf32>
    %10 = tpu.matmul %8, %9, %cst_8 {dimension_numbers = #tpu.dot_dimension_numbers<[1], [0], [0], [1], [0, 0, 1, 1], [], []>} : vector<1x128xbf16>, vector<128x128xbf16>, vector<1x128xf32> -> vector<1x128xf32>
    %c0_9 = arith.constant 0 : index
    %c0_10 = arith.constant 0 : index
    %11 = vector.load %arg5[%c0_9, %c0_10] : memref<1x128xf32, #tpu.memory_space<vmem>>, vector<1x128xf32>
    %12 = arith.addf %10, %11 : vector<1x128xf32>
    %cst_11 = arith.constant 0.000000e+00 : f32
    %13 = vector.broadcast %cst_11 : f32 to vector<1x128xf32>
    %14 = arith.maximumf %12, %13 : vector<1x128xf32>
    %15 = arith.truncf %14 : vector<1x128xf32> to vector<1x128xbf16>
    %c0_12 = arith.constant 0 : index
    %c0_13 = arith.constant 0 : index
    %16 = vector.load %arg6[%c0_12, %c0_13] : memref<128x128xbf16, #tpu.memory_space<vmem>>, vector<128x128xbf16>
    %cst_14 = arith.constant dense<0.000000e+00> : vector<1x128xf32>
    %17 = tpu.matmul %15, %16, %cst_14 {dimension_numbers = #tpu.dot_dimension_numbers<[1], [0], [0], [1], [0, 0, 1, 1], [], []>} : vector<1x128xbf16>, vector<128x128xbf16>, vector<1x128xf32> -> vector<1x128xf32>
    %c0_15 = arith.constant 0 : index
    %c0_16 = arith.constant 0 : index
    %18 = vector.load %arg7[%c0_15, %c0_16] : memref<1x128xf32, #tpu.memory_space<vmem>>, vector<1x128xf32>
    %19 = arith.addf %17, %18 : vector<1x128xf32>
    %cst_17 = arith.constant 0.000000e+00 : f32
    %20 = vector.broadcast %cst_17 : f32 to vector<1x128xf32>
    %21 = arith.maximumf %19, %20 : vector<1x128xf32>
    %22 = arith.mulf %5, %19 : vector<1x128xf32>
    %23 = arith.addf %7, %14 : vector<1x128xf32>
    %24 = arith.addf %23, %21 : vector<1x128xf32>
    %25 = arith.addf %24, %22 : vector<1x128xf32>
    %c0_18 = arith.constant 0 : index
    %c0_19 = arith.constant 0 : index
    %26 = vector.load %arg8[%c0_18, %c0_19] : memref<1x128xf32, #tpu.memory_space<vmem>>, vector<1x128xf32>
    tpu.vector_store %arg8[%c0_18, %c0_19], %25 {strides = array<i32>} : memref<1x128xf32, #tpu.memory_space<vmem>>, vector<1x128xf32>,
    return
  }
  func.func @transform_0(%arg0: i32) -> (i32, i32) {
    %c0_i32 = arith.constant 0 : i32
    %c0_i32_0 = arith.constant 0 : i32
    return %arg0, %c0_i32 : i32, i32
  }
  func.func @transform_1(%arg0: i32) -> (i32, i32) {
    %c0_i32 = arith.constant 0 : i32
    %c0_i32_0 = arith.constant 0 : i32
    %c0_i32_1 = arith.constant 0 : i32
    return %c0_i32, %c0_i32_0 : i32, i32
  }
  func.func @transform_2(%arg0: i32) -> (i32, i32) {
    %c0_i32 = arith.constant 0 : i32
    %c0_i32_0 = arith.constant 0 : i32
    %c0_i32_1 = arith.constant 0 : i32
    return %c0_i32, %c0_i32_0 : i32, i32
  }
  func.func @transform_3(%arg0: i32) -> (i32, i32) {
    %c0_i32 = arith.constant 0 : i32
    %c0_i32_0 = arith.constant 0 : i32
    %c0_i32_1 = arith.constant 0 : i32
    return %c0_i32, %c0_i32_0 : i32, i32
  }
  func.func @transform_4(%arg0: i32) -> (i32, i32) {
    %c0_i32 = arith.constant 0 : i32
    %c0_i32_0 = arith.constant 0 : i32
    %c0_i32_1 = arith.constant 0 : i32
    return %c0_i32, %c0_i32_0 : i32, i32
  }
  func.func @transform_5(%arg0: i32) -> (i32, i32) {
    %c0_i32 = arith.constant 0 : i32
    %c0_i32_0 = arith.constant 0 : i32
    %c0_i32_1 = arith.constant 0 : i32
    return %c0_i32, %c0_i32_0 : i32, i32
  }
  func.func @transform_6(%arg0: i32) -> (i32, i32) {
    %c0_i32 = arith.constant 0 : i32
    %c0_i32_0 = arith.constant 0 : i32
    %c0_i32_1 = arith.constant 0 : i32
    return %c0_i32, %c0_i32_0 : i32, i32
  }
  func.func @transform_7(%arg0: i32) -> (i32, i32) {
    %c0_i32 = arith.constant 0 : i32
    %c0_i32_0 = arith.constant 0 : i32
    return %arg0, %c0_i32 : i32, i32
  }
}

</mosaic_0001>

<bundles_post_ra>
// kernel: mlp_forward.1
= control target key start
LH: loop header
LB: loop body
LE: loop exit
PB: predicated region body
PF: predicated region fallthrough
CT: control target
= control target key end

     0   :  { %12 = vsyncpa [#allocation3], 0  ;;  %s917_s0 = inlined_call_operand.hbm [shape: f32[1,256], index: 0, kind: input, shape index: {}]   ;;  %s918_s1 = inlined_call_operand.hbm [shape: bf16[256,128], index: 1, kind: input, shape index: {}]   ;;  %s919_s2 = inlined_call_operand.vmem [shape: f32[1,128], index: 2, kind: input, shape index: {}]   ;;  %s920_s3 = inlined_call_operand.hbm [shape: bf16[128,128], index: 3, kind: input, shape index: {}]   ;;  %s921_s4 = inlined_call_operand.vmem [shape: f32[1,128], index: 4, kind: input, shape index: {}]   ;;  %s922_s5 = inlined_call_operand.hbm [shape: bf16[128,128], index: 5, kind: input, shape index: {}]   ;;  %s923_s6 = inlined_call_operand.vmem [shape: f32[1,128], index: 6, kind: input, shape index: {}]   ;;  %s924_s7 = inlined_call_operand.hbm [shape: f32[1,128], index: 7, kind: output, shape index: {}]  }
   0x1   :  { %13 = vsyncpa [#allocation6], 0 }
   0x2   :  { %14 = vsyncpa [#allocation9], 0 }
   0x3   :  { %15 = vsyncpa [#allocation4], 0  ;;  %s772_s24 = smov [#allocation5]   ;;  %s654_s28 = scalar_lea.hbm %s918_s1, 2048 }
   0x4   :  { %s31_s25 = sshll.u32 %s772_s24, 4  ;;  %p655_p0 = scmp.ne.s32.totalorder %s918_s1, %s654_s28  ;;  %s32_s25 = int_to_ptr.vmem [resolvable:$true] %s31_s25 }
   0x5   :  { %p658_p1 = scmp.lt.u32.totalorder %s654_s28, %s918_s1 }
   0x7   :  { %p660_p2 = pnand %p658_p1, %p655_p0 }
   0x9   :  { %663 = shalt.err (!%p660_p2)
}
   0xa   :  { %s664_s10 = scalar_lea.vmem %s32_s25, 2048  ;;  %p669_p4 = scmp.lt.s32.totalorder %s32_s25, %s32_s25 }
   0xb   :  { %p665_p3 = scmp.ne.s32.totalorder %s32_s25, %s664_s10  ;;  %p670_p5 = scmp.lt.s32.totalorder %s664_s10, %s664_s10 }
   0xd   :  { %p671_p6 = por %p670_p5, %p669_p4 }
   0xf   :  { %p672_p7 = pnand %p671_p6, %p665_p3 }
  0x11   :  { %675 = shalt.err (!%p672_p7)
}
  0x12   :  { %s773_s11 = smov 64   ;;  %s774_s12 = smov 4  }
  0x13   :  { %37 = dma.hbm_to_vmem [thread:$0]  %s918_s1, 2048, %s32_s25, [#allocation6], %s773_s11, %s773_s11, %s774_s12  }
  0x14   :  { %s775_s15 = smov [#allocation2]   ;;  %s776_s17 = smov [#allocation7]  }
  0x15   :  { %s22_s16 = sshll.u32 %s775_s15, 4  ;;  %s45_s18 = sshll.u32 %s776_s17, 4  ;;  %s23_s16 = int_to_ptr.vmem [resolvable:$true] %s22_s16  ;;  %s46_s18 = int_to_ptr.vmem [resolvable:$true] %s45_s18 }
  0x16   :  { %s676_s21 = scalar_lea.hbm %s917_s0, 32 }
  0x17   :  { %p677_p8 = scmp.ne.s32.totalorder %s917_s0, %s676_s21  ;;  %p680_p9 = scmp.lt.u32.totalorder %s676_s21, %s917_s0 }
  0x19   :  { %p682_p10 = pnand %p680_p9, %p677_p8 }
  0x1b   :  { %685 = shalt.err (!%p682_p10)
}
  0x1c   :  { %s686_s1 = scalar_lea.vmem %s23_s16, 32  ;;  %p691_p12 = scmp.lt.s32.totalorder %s23_s16, %s23_s16 }
  0x1d   :  { %p687_p11 = scmp.ne.s32.totalorder %s23_s16, %s686_s1  ;;  %p692_p13 = scmp.lt.s32.totalorder %s686_s1, %s686_s1 }
  0x1f   :  { %p693_p0 = por %p692_p13, %p691_p12 }
  0x21   :  { %p694_p1 = pnand %p693_p0, %p687_p11 }
  0x23   :  { %697 = shalt.err (!%p694_p1)
}
  0x24   :  { %25 = dma.hbm_to_vmem [thread:$0]  %s917_s0, 32, %s23_s16, [#allocation3]  }
  0x25   :  { %s698_s30 = scalar_lea.hbm %s920_s3, 1024 }
  0x26   :  { %p699_p2 = scmp.ne.s32.totalorder %s920_s3, %s698_s30  ;;  %p702_p3 = scmp.lt.u32.totalorder %s698_s30, %s920_s3 }
  0x28   :  { %p704_p4 = pnand %p702_p3, %p699_p2 }
  0x2a   :  { %707 = shalt.err (!%p704_p4)
}
  0x2b   :  { %s708_s14 = scalar_lea.vmem %s46_s18, 1024  ;;  %p713_p6 = scmp.lt.s32.totalorder %s46_s18, %s46_s18 }
  0x2c   :  { %p709_p5 = scmp.ne.s32.totalorder %s46_s18, %s708_s14  ;;  %p714_p7 = scmp.lt.s32.totalorder %s708_s14, %s708_s14 }
  0x2e   :  { %p715_p8 = por %p714_p7, %p713_p6 }
  0x30   :  { %p716_p9 = pnand %p715_p8, %p709_p5 }
  0x32   :  { %719 = shalt.err (!%p716_p9)
}
  0x33   :  { %51 = dma.hbm_to_vmem [thread:$0]  %s920_s3, 1024, %s46_s18, [#allocation6], %s773_s11, %s773_s11, %s774_s12  }
  0x34   :  { %s777_s16 = smov [#allocation8]   ;;  %s720_s21 = scalar_lea.hbm %s922_s5, 1024 }
  0x35   :  { %s59_s17 = sshll.u32 %s777_s16, 4  ;;  %p721_p10 = scmp.ne.s32.totalorder %s922_s5, %s720_s21  ;;  %s60_s17 = int_to_ptr.vmem [resolvable:$true] %s59_s17 }
  0x36   :  { %p724_p11 = scmp.lt.u32.totalorder %s720_s21, %s922_s5 }
  0x38   :  { %p726_p12 = pnand %p724_p11, %p721_p10 }
  0x3a   :  { %729 = shalt.err (!%p726_p12)
}
  0x3b   :  { %s730_s1 = scalar_lea.vmem %s60_s17, 1024  ;;  %p735_p0 = scmp.lt.s32.totalorder %s60_s17, %s60_s17 }
  0x3c   :  { %p731_p13 = scmp.ne.s32.totalorder %s60_s17, %s730_s1  ;;  %p736_p1 = scmp.lt.s32.totalorder %s730_s1, %s730_s1 }
  0x3e   :  { %p737_p2 = por %p736_p1, %p735_p0 }
  0x40   :  { %p738_p3 = pnand %p737_p2, %p731_p13 }
  0x42   :  { %741 = shalt.err (!%p738_p3)
}
  0x43   :  { %65 = dma.hbm_to_vmem [thread:$0]  %s922_s5, 1024, %s60_s17, [#allocation9], %s773_s11, %s773_s11, %s774_s12  }
  0x44   :  { %764 = dma.done.wait [#allocation3], 32  }
  0x45   :  { %765 = vsyncadd [#allocation3], 4294967264 }
  0x46   :  { %766 = dma.done.wait [#allocation6], 3072  }
  0x47   :  { %767 = vsyncadd [#allocation6], 4294964224 }
  0x48   :  { %768 = dma.done.wait [#allocation9], 1024  }
  0x49   :  { %769 = vsyncadd [#allocation9], 4294966272  ;;  %v778_v0 = vmov 0.0   ;;  %v622_v1 = vld [vmem:[#allocation5 + $0x40] sm:$0xff]   ;;  %v624_v3 = vld [vmem:[#allocation5 + $0x48] sm:$0xff]   ;;  %v83_v6 = vlaneseq  ;;  %vm779_vm0 = vmmov 0  }
  0x4a   :  { %573 = vmatprep.subr.bf16.mxu1 %v778_v0  ;;  %v623_v2 = vld [vmem:[#allocation5] sm:$0xff]   ;;  %533 = vmatprep.subr.bf16.mxu0 %v622_v1  ;;  %v625_v4 = vld [vmem:[#allocation5 + $0x8] sm:$0xff]   ;;  %v626_v5 = vld [vmem:[#allocation5 + $0x50] sm:$0xff]  }
  0x4b   :  { %534 = vmatpush3.bf16.msra.mxu0 %v623_v2  ;;  %v627_v7 = vld [vmem:[#allocation5 + $0x10] sm:$0xff]   ;;  %v628_v8 = vld [vmem:[#allocation5 + $0x58] sm:$0xff]   ;;  %v84_v9 = vshrl.u32 %v83_v6, 7  ;;  %v630_v11 = vld [vmem:[#allocation5 + $0x60] sm:$0xff]   ;;  %589 = vmatprep.mubr.msk.bf16.mxu1 %vm779_vm0, %v778_v0 }
  0x4c   :  { %535 = vmatprep.subr.bf16.mxu0 %v624_v3  ;;  %v629_v10 = vld [vmem:[#allocation5 + $0x18] sm:$0xff]   ;;  %v631_v13 = vld [vmem:[#allocation5 + $0x20] sm:$0xff]   ;;  %v632_v14 = vld [vmem:[#allocation5 + $0x68] sm:$0xff]  }
  0x4d   :  { %v89_v12 = vsub.s32 1, %v84_v9  ;;  %v81_v15 = vld [vmem:[#allocation2] sm:$0x3]  ;;  %v638_v17 = vld [vmem:[#allocation7] sm:$0xff]   ;;  %v633_v18 = vld [vmem:[#allocation5 + $0x28] sm:$0xff]   ;;  %v85_v24 = vsub.s32 0, %v84_v9 }
  0x4e   :  { %574 = vmatpush3.bf16.msra.mxu1 %v638_v17  ;;  %v639_v20 = vld [vmem:[#allocation7 + $0x8] sm:$0xff]   ;;  %v634_v21 = vld [vmem:[#allocation5 + $0x70] sm:$0xff]   ;;  %v636_v23 = vld [vmem:[#allocation5 + $0x78] sm:$0xff]  }
  0x4f   :  { %536 = vmatpush3.bf16.msra.mxu0 %v625_v4  ;;  %v90_v16 = vrot.slane %v81_v15, %v89_v12  ;;  %575 = vmatprep.subr.bf16.mxu1 %v778_v0  ;;  %v635_v22 = vld [vmem:[#allocation5 + $0x30] sm:$0xff]   ;;  %v637_v26 = vld [vmem:[#allocation5 + $0x38] sm:$0xff]   ;;  %v86_v28 = vrot.slane %v81_v15, %v85_v24  ;;  %v642_v30 = vld [vmem:[#allocation7 + $0x20] sm:$0xff]  }
  0x50   :  { %537 = vmatprep.subr.bf16.mxu0 %v626_v5  ;;  %v640_v25 = vld [vmem:[#allocation7 + $0x10] sm:$0xff]   ;;  %v641_v27 = vld [vmem:[#allocation7 + $0x18] sm:$0xff]   ;;  %v643_v31 = vld [vmem:[#allocation7 + $0x28] sm:$0xff]  }
  0x51   :  { %v94_v19 = vpack.c.bf16 %v90_v16, %v90_v16  ;;  %v93_v29 = vpack.c.bf16 %v86_v28, %v86_v28  ;;  %v644_v32 = vld [vmem:[#allocation7 + $0x30] sm:$0xff]   ;;  %v645_v33 = vld [vmem:[#allocation7 + $0x38] sm:$0xff]   ;;  %v646_v34 = vld [vmem:[#allocation8] sm:$0xff]  }
  0x52   :  { %576 = vmatpush3.bf16.msra.mxu1 %v639_v20  ;;  %v647_v35 = vld [vmem:[#allocation8 + $0x8] sm:$0xff]   ;;  %v648_v36 = vld [vmem:[#allocation8 + $0x10] sm:$0xff]   ;;  %v649_v37 = vld [vmem:[#allocation8 + $0x18] sm:$0xff]  }
  0x53   :  { %538 = vmatpush3.bf16.msra.mxu0 %v627_v7  ;;  %256 = vmatprep.mubr.bf16.mxu0 %v94_v19  ;;  %v650_v38 = vld [vmem:[#allocation8 + $0x20] sm:$0xff]   ;;  %v651_v39 = vld [vmem:[#allocation8 + $0x28] sm:$0xff]   ;;  %v127_v41 = vld [vmem:[%s919_s2] sm:$0x1] }
  0x54   :  { %539 = vmatprep.subr.bf16.mxu0 %v628_v8  ;;  %577 = vmatprep.subr.bf16.mxu1 %v778_v0  ;;  %v652_v49 = vld [vmem:[#allocation8 + $0x30] sm:$0xff]   ;;  %v653_v50 = vld [vmem:[#allocation8 + $0x38] sm:$0xff]  }
  0x55   :  { %v282_v51 = vld [vmem:[%s921_s4] sm:$0x1]  ;;  %s780_s4 = smov [#allocation10]  }
  0x56   :  { %578 = vmatpush3.bf16.msra.mxu1 %v640_v25  ;;  %v389_v59 = vld [vmem:[%s923_s6] sm:$0x1]  ;;  %s490_s28 = sshll.u32 %s780_s4, 4  ;;  %s491_s28 = int_to_ptr.vmem [resolvable:$true] %s490_s28 }
  0x57   :  { %540 = vmatpush3.bf16.msra.mxu0 %v629_v10  ;;  %579 = vmatprep.subr.bf16.mxu1 %v778_v0  ;;  %s742_s29 = scalar_lea.vmem %s491_s28, 16  ;;  %s746_s30 = scalar_lea.vmem %s491_s28, 32 }
  0x58   :  { %541 = vmatprep.subr.bf16.mxu0 %v630_v11  ;;  %p743_p4 = scmp.ne.s32.totalorder %s491_s28, %s742_s29  ;;  %p747_p5 = scmp.lt.s32.totalorder %s491_s28, %s491_s28 }
  0x59   :  { %p748_p6 = scmp.lt.s32.totalorder %s746_s30, %s742_s29 }
  0x5a   :  { %580 = vmatpush3.bf16.msra.mxu1 %v641_v27 }
  0x5b   :  { %542 = vmatpush3.bf16.msra.mxu0 %v631_v13  ;;  %581 = vmatprep.subr.bf16.mxu1 %v778_v0  ;;  %p749_p7 = por %p748_p6, %p747_p5 }
  0x5c   :  { %543 = vmatprep.subr.bf16.mxu0 %v632_v14 }
  0x5d   :  { %p750_p8 = pnand %p749_p7, %p743_p4 }
  0x5e   :  { %582 = vmatpush3.bf16.msra.mxu1 %v642_v30 }
  0x5f   :  { %544 = vmatpush3.bf16.msra.mxu0 %v633_v18  ;;  %583 = vmatprep.subr.bf16.mxu1 %v778_v0 }
  0x60   :  { %545 = vmatprep.subr.bf16.mxu0 %v634_v21 }
  0x62   :  { %584 = vmatpush3.bf16.msra.mxu1 %v643_v31 }
  0x63   :  { %546 = vmatpush3.bf16.msra.mxu0 %v635_v22  ;;  %585 = vmatprep.subr.bf16.mxu1 %v778_v0 }
  0x64   :  { %547 = vmatprep.subr.bf16.mxu0 %v636_v23 }
  0x66   :  { %586 = vmatpush3.bf16.msra.mxu1 %v644_v32 }
  0x67   :  { %548 = vmatpush3.bf16.msra.mxu0 %v637_v26  ;;  %587 = vmatprep.subr.bf16.mxu1 %v778_v0 }
  0x68   :  { %593 = vmatprep.subr.bf16.mxu0 %v778_v0 }
  0x6a   :  { %257 = vmatmul.mubr.bf16.vlgmr.msra.gmra.mrb[0].mxu0 %v93_v29  ;;  %588 = vmatpush3.bf16.msra.mxu1 %v645_v33 }
  0x6b   :  { %609 = vmatprep.mubr.msk.bf16.mxu0 %vm779_vm0, %v778_v0  ;;  %594 = vmatpush3.bf16.msra.mxu0 %v646_v34 }
  0x6c   :  { %595 = vmatprep.subr.bf16.mxu0 %v778_v0 }
  0x6f   :  { %596 = vmatpush3.bf16.msra.mxu0 %v647_v35 }
  0x70   :  { %597 = vmatprep.subr.bf16.mxu0 %v778_v0 }
  0x73   :  { %598 = vmatpush3.bf16.msra.mxu0 %v648_v36 }
  0x74   :  { %599 = vmatprep.subr.bf16.mxu0 %v778_v0 }
  0x77   :  { %600 = vmatpush3.bf16.msra.mxu0 %v649_v37 }
  0x78   :  { %601 = vmatprep.subr.bf16.mxu0 %v778_v0 }
  0x7b   :  { %602 = vmatpush3.bf16.msra.mxu0 %v650_v38 }
  0x7c   :  { %603 = vmatprep.subr.bf16.mxu0 %v778_v0 }
  0x7f   :  { %604 = vmatpush3.bf16.msra.mxu0 %v651_v39 }
  0x80   :  { %605 = vmatprep.subr.bf16.mxu0 %v778_v0 }
  0x83   :  { %606 = vmatpush3.bf16.msra.mxu0 %v652_v49 }
  0x84   :  { %607 = vmatprep.subr.bf16.mxu0 %v778_v0 }
  0x87   :  { %608 = vmatpush3.bf16.msra.mxu0 %v653_v50 }
 0x13d   :  { %v549_v40 = vpop.f32.mrb[0].mxu0 }
 0x13e   :  { %v550_v42 = vpop.f32.mrb[1].mxu0 }
 0x13f   :  { %v551_v43 = vadd.f32 %v550_v42, %v549_v40  ;;  %v552_v44 = vpop.f32.mrb[2].mxu0 }
 0x140   :  { %v553_v45 = vpop.f32.mrb[3].mxu0 }
 0x141   :  { %v259_v46 = vadd.f32 %v551_v43, %v127_v41 }
 0x143   :  { %v264_v47 = vmax.f32 %v259_v46, 0.0 }
 0x145   :  { %v265_v48 = vpack.c.bf16 %v264_v47, %v264_v47 }
 0x147   :  { %590 = vmatmul.mubr.bf16.vlgmr.msra.gmra.mrb[0].mxu1 %v265_v48 }
 0x21a   :  { %v365_v52 = vpop.f32.mrb[0].mxu1 }
 0x21b   :  { %v366_v53 = vadd.f32 %v365_v52, %v282_v51  ;;  %v591_v54 = vpop.f32.mrb[1].mxu1 }
 0x21c   :  { %v368_v55 = vpop.f32.mrb[2].mxu1 }
 0x21d   :  { %v371_v56 = vmax.f32 %v366_v53, 0.0  ;;  %v592_v57 = vpop.f32.mrb[3].mxu1 }
 0x21f   :  { %v372_v58 = vpack.c.bf16 %v371_v56, %v371_v56  ;;  %v480_v0 = vadd.f32 %v371_v56, %v264_v47 }
 0x221   :  { %610 = vmatmul.mubr.bf16.vlgmr.msra.gmra.mrb[4].mxu0 %v372_v58 }
 0x2f4   :  { %v472_v60 = vpop.f32.mrb[4].mxu0 }
 0x2f5   :  { %v473_v61 = vadd.f32 %v472_v60, %v389_v59  ;;  %v611_v62 = vpop.f32.mrb[5].mxu0 }
 0x2f6   :  { %v475_v63 = vpop.f32.mrb[6].mxu0 }
 0x2f7   :  { %v478_v1 = vmax.f32 %v473_v61, 0.0  ;;  %v612_v2 = vpop.f32.mrb[7].mxu0  ;;  %v479_v3 = vmul.f32 %v473_v61, %v259_v46 }
 0x2f9   :  { %v481_v4 = vadd.f32 %v480_v0, %v478_v1 }
 0x2fb   :  { %v482_v5 = vadd.f32 %v481_v4, %v479_v3 }
 0x2fd   :  { %483 = vst [vmem:[#allocation10] sm:$0x1] %v482_v5 }
 0x2fe   :  { %753 = shalt.err (!%p750_p8)
}
 0x2ff   :  { %s754_s9 = scalar_lea.hbm %s924_s7, 16 }
 0x300   :  { %p755_p9 = scmp.ne.s32.totalorder %s924_s7, %s754_s9  ;;  %p758_p10 = scmp.lt.u32.totalorder %s754_s9, %s924_s7 }
 0x302   :  { %p760_p11 = pnand %p758_p10, %p755_p9 }
 0x304   :  { %763 = shalt.err (!%p760_p11)
}
 0x305   :  { %493 = dma.vmem_to_hbm [thread:$0]  %s491_s28, 16, %s924_s7, [#allocation4]  }
 0x306   :  { %770 = dma.done.wait [#allocation4], 16  }
 0x307   :  { %771 = vsyncadd [#allocation4], 4294967280 }
 0x308   :  { %497 = vsyncpa [#allocation3], 1 }
 0x309   :  { %498 = vsyncpa [#allocation6], 1 }
 0x30a   :  { %499 = vsyncpa [#allocation9], 1 }
 0x30b   :  { %500 = vsyncpa [#allocation4], 1 }

</bundles_post_ra>
